<compile_context>
chip_gen: v5e
topology: v5e:2x2
jax: 0.10.0
libtpu: 0.0.40
codegen_flags: <defaults>
</compile_context>

<pallas_src>
import functools
import math
import numpy as np
import jax
import jax.numpy as jnp
from jax import lax
from jax.experimental import pallas as pl
from jax.experimental.pallas import tpu as pltpu

STEPS = 216
BLK = 8                                   # Euler steps per full-vreg block
LANES = 128                               # batch lane tile (one vreg lane width)
H = np.float32(1.0 / 216.0)               # ODEParams.h
A_CONST = np.float32(0.005)               # ODEParams.A
F2 = np.float32(0.25)                     # ODEParams.f2
X0 = np.float32(-0.417750770388669)
Y0 = np.float32(-0.9085616622823985)
MIN_VAL = np.float32(-0.01563)            # scale_signal defaults
MAX_VAL = np.float32(0.042557)
TWO_PI = np.float32(2.0 * math.pi)
INV_TWO_PI = np.float32(1.0 / (2.0 * math.pi))


def _trunc(v):
    # round-toward-zero built from floor/ceil (both lower on TPU)
    return jnp.where(v >= 0, jnp.floor(v), jnp.ceil(v))


def ecg_euler_kernel(theta_ref, z0t_ref, params_ref, v0_ref, out_ref):
    """Vectorized forcing + blocked Euler recurrence + per-beat min/max scaling.

    theta_ref : VMEM f32[216, 128]  per-step limit-cycle phase atan2(y, x), lane-replicated
    z0t_ref   : VMEM f32[216, 128]  per-step baseline A*sin(2*pi*f2*t), lane-replicated
    params_ref: VMEM f32[16, 128]   rows 0..14 = (a_P,b_P,th_P, ..., a_T,b_T,th_T), row 15 pad
    v0_ref    : VMEM f32[1, 128]    initial z per batch lane
    out_ref   : VMEM f32[216, 128]  scaled z trajectory (steps x batch-lane)
    """
    p = params_ref[...]                               # (16, LANES)
    waves = []
    for k in range(5):                                # P, Q, R, S, T
        a_k = p[3 * k + 0: 3 * k + 1, :]              # (1, LANES)
        b_k = p[3 * k + 1: 3 * k + 2, :]
        th_k = p[3 * k + 2: 3 * k + 3, :]
        inv_denom_k = 1.0 / (2.0 * b_k * b_k)         # loop-invariant (5 tiny divides total)
        waves.append((a_k, th_k, inv_denom_k))

    decay = np.float32(1.0) - H                       # (1 - h)

    def block_body(b, z):                             # z: (1, LANES) loop carry
        row0 = pl.multiple_of(b * BLK, BLK)
        theta_blk = theta_ref[pl.ds(row0, BLK), :]    # (8, LANES)
        z0t_blk = z0t_ref[pl.ds(row0, BLK), :]        # (8, LANES)

        # Gaussian forcing, fully vectorized over 8 steps x 128 lanes (no divides).
        g = jnp.zeros_like(theta_blk)
        for a_k, th_k, inv_denom_k in waves:          # unrolled x5
            dth = theta_blk - th_k
            dth = dth - TWO_PI * _trunc(dth * INV_TWO_PI)      # torch.fmod(dth, 2*pi)
            g = g + (a_k * dth) * jnp.exp(-(dth * dth) * inv_denom_k)
        u = H * (z0t_blk - g)                         # (8, LANES)

        # Serial part: z_{n+1} = (1-H)*z_n + u_n, 8 steps unrolled per iteration.
        rows = []
        for r in range(BLK):
            z = decay * z + u[r:r + 1, :]
            rows.append(z)
        out_ref[pl.ds(row0, BLK), :] = jnp.concatenate(rows, axis=0)   # full (8,128) store
        return z

    lax.fori_loop(0, STEPS // BLK, block_body, v0_ref[...])

    # scale_signal: per-lane (per-beat) min/max over the 216 steps
    z_all = out_ref[...]                              # (216, LANES)
    zmin = jnp.min(z_all, axis=0, keepdims=True)
    zmax = jnp.max(z_all, axis=0, keepdims=True)
    zrange = jnp.maximum(zmax - zmin, np.float32(1e-30))   # guard degenerate/pad lanes
    scale = MAX_VAL / zrange                          # one (1,128) divide, not a slab divide
    out_ref[...] = (z_all - zmin) * scale + MIN_VAL


def _precompute_phase_and_baseline():
    """Host glue: replicate the batch-independent x/y limit-cycle in float32."""
    # Deterministic RR-interval series (stands in for ODEParams.rrpc).
    # TODO(synk): the original rrprocess uses random spectral phases; replaced
    # with a deterministic RR series around 1.0 s.
    n_rr = 256
    k = np.arange(n_rr, dtype=np.float32)
    rrpc = (1.0 + 0.05 * np.sin(2.0 * np.pi * k / n_rr)).astype(np.float32)

    # time grid accumulated in float32 exactly like the torch loop (t += 1/216)
    t_list = np.zeros(STEPS, dtype=np.float32)
    t = np.float32(0.0)
    for i in range(1, STEPS):
        t = np.float32(t + H)
        t_list[i] = t

    idx = (1 + (t_list / H).astype(np.int32)) % n_rr
    rr_sel = rrpc[idx]
    omega = np.where(rr_sel == 0.0,
                     np.float32(2.0 * math.pi / 1e-3),
                     (2.0 * np.pi / rr_sel)).astype(np.float32)

    theta_arr = np.zeros(STEPS, dtype=np.float32)
    z0t_arr = np.zeros(STEPS, dtype=np.float32)
    x, y = X0, Y0
    for i in range(STEPS):
        theta_arr[i] = np.float32(np.arctan2(y, x))
        z0t_arr[i] = np.float32(A_CONST * np.sin(np.float32(2.0 * np.pi) * F2 * t_list[i]))
        alpha = np.float32(1.0 - np.sqrt(np.float32(x * x + y * y)))
        f_x = np.float32(alpha * x - omega[i] * y)
        f_y = np.float32(alpha * y + omega[i] * x)
        x = np.float32(x + H * f_x)
        y = np.float32(y + H * f_y)
    return theta_arr, z0t_arr


@functools.lru_cache(maxsize=1)
def _get_phase_baseline_slabs():
    """Cached: (216, LANES) lane-replicated theta / z0t VMEM slabs + raw 1-D arrays."""
    theta_arr, z0t_arr = _precompute_phase_and_baseline()
    theta2d = jnp.asarray(
        np.ascontiguousarray(np.broadcast_to(theta_arr[:, None], (STEPS, LANES))))
    z0t2d = jnp.asarray(
        np.ascontiguousarray(np.broadcast_to(z0t_arr[:, None], (STEPS, LANES))))
    return theta2d, z0t2d, theta_arr, z0t_arr


@jax.jit
def _euler_pallas(theta2d, z0t2d, params_pad, v0_pad):
    bpad = params_pad.shape[1]
    ntiles = bpad // LANES
    return pl.pallas_call(
        ecg_euler_kernel,
        out_shape=jax.ShapeDtypeStruct((STEPS, bpad), jnp.float32),
        grid=(ntiles,),
        in_specs=[
            pl.BlockSpec((STEPS, LANES), lambda t: (0, 0)),   # theta (same for all tiles)
            pl.BlockSpec((STEPS, LANES), lambda t: (0, 0)),   # z0(t)
            pl.BlockSpec((16, LANES), lambda t: (0, t)),      # params per lane tile
            pl.BlockSpec((1, LANES), lambda t: (0, t)),       # v0 per lane tile
        ],
        out_specs=pl.BlockSpec((STEPS, LANES), lambda t: (0, t)),
        compiler_params=pltpu.CompilerParams(
            dimension_semantics=("parallel",)),               # shards lane tiles across TCs
    )(theta2d, z0t2d, params_pad, v0_pad)


def euler_forward(params_batch, v0):
    """Euler().forward(x, v0): params_batch (B, 15) f32, v0 (B,) f32 -> (B, 216) f32."""
    params_batch = jnp.asarray(params_batch, jnp.float32)
    v0 = jnp.asarray(v0, jnp.float32)
    B = params_batch.shape[0]
    assert params_batch.shape[1] == 15
    bpad = max(LANES, ((B + LANES - 1) // LANES) * LANES)

    theta2d, z0t2d, _, _ = _get_phase_baseline_slabs()

    # pad lanes use a=0, b=1, th=0 per wave (benign: zero forcing, finite 1/(2b^2))
    pad_wave = jnp.tile(jnp.array([0.0, 1.0, 0.0], jnp.float32), 5)       # (15,)
    params_pad = jnp.broadcast_to(pad_wave[:, None], (15, bpad))
    params_pad = params_pad.at[:, :B].set(params_batch.T)
    params_pad = jnp.concatenate(
        [params_pad, jnp.zeros((1, bpad), jnp.float32)], axis=0)          # (16, bpad)
    v0_pad = jnp.zeros((1, bpad), jnp.float32).at[0, :B].set(v0)

    out = _euler_pallas(theta2d, z0t2d, params_pad, v0_pad)               # (216, bpad)
    return out[:, :B].T                                                   # (B, 216)


def _reference_numpy(params_batch, v0, theta_arr, z0t_arr):
    """Straightforward per-beat Euler + scale_signal, same precomputed phase/baseline."""
    params = np.asarray(params_batch, np.float64)
    v0 = np.asarray(v0, np.float64)
    B = params.shape[0]
    z_out = np.zeros((B, STEPS), np.float64)
    for j in range(B):
        a = params[j, 0::3]
        b = params[j, 1::3]
        th = params[j, 2::3]
        z = float(v0[j])
        for i in range(STEPS):
            dth = theta_arr[i] - th
            dth = dth - 2.0 * np.pi * np.trunc(dth / (2.0 * np.pi))
            zsum = np.sum(a * dth * np.exp(-(dth * dth) / (2.0 * b * b)))
            f_z = -zsum - (z - z0t_arr[i])
            z = z + float(H) * f_z
            z_out[j, i] = z
    zmin = z_out.min(axis=1, keepdims=True)
    zmax = z_out.max(axis=1, keepdims=True)
    zrange = zmax - zmin
    return (z_out - zmin) * float(MAX_VAL) / zrange + float(MIN_VAL)


if __name__ == "__main__":
    B = 4
    key = jax.random.PRNGKey(0)
    k1, k2 = jax.random.split(key)
    # Typical McSharry PQRST parameters (a_i, b_i, theta_i) x 5, with small jitter.
    base = jnp.array([1.2, 0.25, -math.pi / 3.0,
                      -5.0, 0.1, -math.pi / 12.0,
                      30.0, 0.1, 0.0,
                      -7.5, 0.1, math.pi / 12.0,
                      0.75, 0.4, math.pi / 2.0], dtype=jnp.float32)
    params_batch = base[None, :] + 0.02 * base[None, :] * jax.random.normal(
        k1, (B, 15), jnp.float32)
    v0 = 0.03 * jax.random.normal(k2, (B,), jnp.float32)

    out = euler_forward(params_batch, v0)
    out = jax.block_until_ready(out)
    assert out.shape == (B, STEPS), out.shape
    assert bool(jnp.all(jnp.isfinite(out)))

    # numerical sanity check against a plain NumPy reference (same phase/baseline glue)
    _, _, theta_arr, z0t_arr = _get_phase_baseline_slabs()
    ref = _reference_numpy(np.asarray(params_batch), np.asarray(v0), theta_arr, z0t_arr)
    err = float(np.max(np.abs(np.asarray(out, np.float64) - ref)))
    assert err < 1e-3, f"max abs error vs reference: {err}"

    print("KERNEL_OK")
</pallas_src>

<mosaic_0001>
module attributes {stable_mosaic.version = 11 : i64} {
  func.func @ecg_euler_kernel(%arg0: i32, %arg1: memref<216x128xf32, #tpu.memory_space<vmem>>, %arg2: memref<216x128xf32, #tpu.memory_space<vmem>>, %arg3: memref<16x128xf32, #tpu.memory_space<vmem>>, %arg4: memref<1x128xf32, #tpu.memory_space<vmem>>, %arg5: memref<216x128xf32, #tpu.memory_space<vmem>>) attributes {dimension_semantics = [#tpu.dimension_semantics<parallel>], iteration_bounds = array<i64: 1>, scalar_prefetch = 0 : i64, scratch_operands = 0 : i64, tpu.core_type = #tpu.core_type<tc>, window_params = [{pipeline_mode = #tpu.pipeline_mode<synchronous>, transform_indices = @transform_0, window_bounds = array<i64: 216, 128>}, {pipeline_mode = #tpu.pipeline_mode<synchronous>, transform_indices = @transform_1, window_bounds = array<i64: 216, 128>}, {transform_indices = @transform_2, window_bounds = array<i64: 16, 128>}, {transform_indices = @transform_3, window_bounds = array<i64: 1, 128>}, {transform_indices = @transform_4, window_bounds = array<i64: 216, 128>}]} {
    %c0 = arith.constant 0 : index
    %c0_0 = arith.constant 0 : index
    %0 = vector.load %arg3[%c0, %c0_0] : memref<16x128xf32, #tpu.memory_space<vmem>>, vector<16x128xf32>
    %1 = vector.extract_strided_slice %0 {offsets = [0, 0], sizes = [1, 128], strides = [1, 1]} : vector<16x128xf32> to vector<1x128xf32>
    %2 = vector.extract_strided_slice %0 {offsets = [1, 0], sizes = [1, 128], strides = [1, 1]} : vector<16x128xf32> to vector<1x128xf32>
    %3 = vector.extract_strided_slice %0 {offsets = [2, 0], sizes = [1, 128], strides = [1, 1]} : vector<16x128xf32> to vector<1x128xf32>
    %cst = arith.constant 2.000000e+00 : f32
    %4 = vector.broadcast %cst : f32 to vector<1x128xf32>
    %5 = arith.mulf %4, %2 : vector<1x128xf32>
    %6 = arith.mulf %5, %2 : vector<1x128xf32>
    %cst_1 = arith.constant 1.000000e+00 : f32
    %7 = vector.broadcast %cst_1 : f32 to vector<1x128xf32>
    %8 = arith.divf %7, %6 : vector<1x128xf32>
    %9 = vector.extract_strided_slice %0 {offsets = [3, 0], sizes = [1, 128], strides = [1, 1]} : vector<16x128xf32> to vector<1x128xf32>
    %10 = vector.extract_strided_slice %0 {offsets = [4, 0], sizes = [1, 128], strides = [1, 1]} : vector<16x128xf32> to vector<1x128xf32>
    %11 = vector.extract_strided_slice %0 {offsets = [5, 0], sizes = [1, 128], strides = [1, 1]} : vector<16x128xf32> to vector<1x128xf32>
    %cst_2 = arith.constant 2.000000e+00 : f32
    %12 = vector.broadcast %cst_2 : f32 to vector<1x128xf32>
    %13 = arith.mulf %12, %10 : vector<1x128xf32>
    %14 = arith.mulf %13, %10 : vector<1x128xf32>
    %cst_3 = arith.constant 1.000000e+00 : f32
    %15 = vector.broadcast %cst_3 : f32 to vector<1x128xf32>
    %16 = arith.divf %15, %14 : vector<1x128xf32>
    %17 = vector.extract_strided_slice %0 {offsets = [6, 0], sizes = [1, 128], strides = [1, 1]} : vector<16x128xf32> to vector<1x128xf32>
    %18 = vector.extract_strided_slice %0 {offsets = [7, 0], sizes = [1, 128], strides = [1, 1]} : vector<16x128xf32> to vector<1x128xf32>
    %19 = vector.extract_strided_slice %0 {offsets = [8, 0], sizes = [1, 128], strides = [1, 1]} : vector<16x128xf32> to vector<1x128xf32>
    %cst_4 = arith.constant 2.000000e+00 : f32
    %20 = vector.broadcast %cst_4 : f32 to vector<1x128xf32>
    %21 = arith.mulf %20, %18 : vector<1x128xf32>
    %22 = arith.mulf %21, %18 : vector<1x128xf32>
    %cst_5 = arith.constant 1.000000e+00 : f32
    %23 = vector.broadcast %cst_5 : f32 to vector<1x128xf32>
    %24 = arith.divf %23, %22 : vector<1x128xf32>
    %25 = vector.extract_strided_slice %0 {offsets = [9, 0], sizes = [1, 128], strides = [1, 1]} : vector<16x128xf32> to vector<1x128xf32>
    %26 = vector.extract_strided_slice %0 {offsets = [10, 0], sizes = [1, 128], strides = [1, 1]} : vector<16x128xf32> to vector<1x128xf32>
    %27 = vector.extract_strided_slice %0 {offsets = [11, 0], sizes = [1, 128], strides = [1, 1]} : vector<16x128xf32> to vector<1x128xf32>
    %cst_6 = arith.constant 2.000000e+00 : f32
    %28 = vector.broadcast %cst_6 : f32 to vector<1x128xf32>
    %29 = arith.mulf %28, %26 : vector<1x128xf32>
    %30 = arith.mulf %29, %26 : vector<1x128xf32>
    %cst_7 = arith.constant 1.000000e+00 : f32
    %31 = vector.broadcast %cst_7 : f32 to vector<1x128xf32>
    %32 = arith.divf %31, %30 : vector<1x128xf32>
    %33 = vector.extract_strided_slice %0 {offsets = [12, 0], sizes = [1, 128], strides = [1, 1]} : vector<16x128xf32> to vector<1x128xf32>
    %34 = vector.extract_strided_slice %0 {offsets = [13, 0], sizes = [1, 128], strides = [1, 1]} : vector<16x128xf32> to vector<1x128xf32>
    %35 = vector.extract_strided_slice %0 {offsets = [14, 0], sizes = [1, 128], strides = [1, 1]} : vector<16x128xf32> to vector<1x128xf32>
    %cst_8 = arith.constant 2.000000e+00 : f32
    %36 = vector.broadcast %cst_8 : f32 to vector<1x128xf32>
    %37 = arith.mulf %36, %34 : vector<1x128xf32>
    %38 = arith.mulf %37, %34 : vector<1x128xf32>
    %cst_9 = arith.constant 1.000000e+00 : f32
    %39 = vector.broadcast %cst_9 : f32 to vector<1x128xf32>
    %40 = arith.divf %39, %38 : vector<1x128xf32>
    %c0_10 = arith.constant 0 : index
    %c0_11 = arith.constant 0 : index
    %41 = vector.load %arg4[%c0_10, %c0_11] : memref<1x128xf32, #tpu.memory_space<vmem>>, vector<1x128xf32>
    %c0_i32 = arith.constant 0 : i32
    %c27_i32 = arith.constant 27 : i32
    %42 = arith.addi %c0_i32, %c27_i32 : i32
    %c1_i32 = arith.constant 1 : i32
    %43 = scf.for %arg6 = %c0_i32 to %42 step %c1_i32 iter_args(%arg7 = %41) -> (vector<1x128xf32>)  : i32 {
      %c8_i32 = arith.constant 8 : i32
      %61 = arith.muli %arg6, %c8_i32 : i32
      %62 = tpu.assume_multiple %61, 8 : i32
      %63 = arith.index_cast %62 : i32 to index
      %c0_22 = arith.constant 0 : index
      %64 = vector.load %arg1[%63, %c0_22] : memref<216x128xf32, #tpu.memory_space<vmem>>, vector<8x128xf32>
      %65 = arith.index_cast %62 : i32 to index
      %c0_23 = arith.constant 0 : index
      %66 = vector.load %arg2[%65, %c0_23] : memref<216x128xf32, #tpu.memory_space<vmem>>, vector<8x128xf32>
      %cst_24 = arith.constant 0.000000e+00 : f32
      %67 = vector.broadcast %cst_24 : f32 to vector<8x128xf32>
      %68 = vector.broadcast %3 : vector<1x128xf32> to vector<8x128xf32>
      %69 = arith.subf %64, %68 : vector<8x128xf32>
      %cst_25 = arith.constant 0.159154937 : f32
      %70 = vector.broadcast %cst_25 : f32 to vector<8x128xf32>
      %71 = arith.mulf %69, %70 : vector<8x128xf32>
      %cst_26 = arith.constant 0.000000e+00 : f32
      %72 = vector.broadcast %cst_26 : f32 to vector<8x128xf32>
      %73 = arith.cmpf oge, %71, %72 : vector<8x128xf32>
      %74 = math.floor %71 : vector<8x128xf32>
      %75 = math.ceil %71 : vector<8x128xf32>
      %76 = arith.select %73, %74, %75 : vector<8x128xi1>, vector<8x128xf32>
      %cst_27 = arith.constant 6.28318548 : f32
      %77 = vector.broadcast %cst_27 : f32 to vector<8x128xf32>
      %78 = arith.mulf %77, %76 : vector<8x128xf32>
      %79 = arith.subf %69, %78 : vector<8x128xf32>
      %80 = vector.broadcast %1 : vector<1x128xf32> to vector<8x128xf32>
      %81 = arith.mulf %80, %79 : vector<8x128xf32>
      %82 = arith.mulf %79, %79 : vector<8x128xf32>
      %cst_28 = arith.constant 0.000000e+00 : f32
      %83 = vector.broadcast %cst_28 : f32 to vector<8x128xf32>
      %84 = arith.subf %83, %82 : vector<8x128xf32>
      %85 = vector.broadcast %8 : vector<1x128xf32> to vector<8x128xf32>
      %86 = arith.mulf %84, %85 : vector<8x128xf32>
      %87 = math.exp %86 : vector<8x128xf32>
      %88 = arith.mulf %81, %87 : vector<8x128xf32>
      %89 = arith.addf %67, %88 : vector<8x128xf32>
      %90 = vector.broadcast %11 : vector<1x128xf32> to vector<8x128xf32>
      %91 = arith.subf %64, %90 : vector<8x128xf32>
      %cst_29 = arith.constant 0.159154937 : f32
      %92 = vector.broadcast %cst_29 : f32 to vector<8x128xf32>
      %93 = arith.mulf %91, %92 : vector<8x128xf32>
      %cst_30 = arith.constant 0.000000e+00 : f32
      %94 = vector.broadcast %cst_30 : f32 to vector<8x128xf32>
      %95 = arith.cmpf oge, %93, %94 : vector<8x128xf32>
      %96 = math.floor %93 : vector<8x128xf32>
      %97 = math.ceil %93 : vector<8x128xf32>
      %98 = arith.select %95, %96, %97 : vector<8x128xi1>, vector<8x128xf32>
      %cst_31 = arith.constant 6.28318548 : f32
      %99 = vector.broadcast %cst_31 : f32 to vector<8x128xf32>
      %100 = arith.mulf %99, %98 : vector<8x128xf32>
      %101 = arith.subf %91, %100 : vector<8x128xf32>
      %102 = vector.broadcast %9 : vector<1x128xf32> to vector<8x128xf32>
      %103 = arith.mulf %102, %101 : vector<8x128xf32>
      %104 = arith.mulf %101, %101 : vector<8x128xf32>
      %cst_32 = arith.constant 0.000000e+00 : f32
      %105 = vector.broadcast %cst_32 : f32 to vector<8x128xf32>
      %106 = arith.subf %105, %104 : vector<8x128xf32>
      %107 = vector.broadcast %16 : vector<1x128xf32> to vector<8x128xf32>
      %108 = arith.mulf %106, %107 : vector<8x128xf32>
      %109 = math.exp %108 : vector<8x128xf32>
      %110 = arith.mulf %103, %109 : vector<8x128xf32>
      %111 = arith.addf %89, %110 : vector<8x128xf32>
      %112 = vector.broadcast %19 : vector<1x128xf32> to vector<8x128xf32>
      %113 = arith.subf %64, %112 : vector<8x128xf32>
      %cst_33 = arith.constant 0.159154937 : f32
      %114 = vector.broadcast %cst_33 : f32 to vector<8x128xf32>
      %115 = arith.mulf %113, %114 : vector<8x128xf32>
      %cst_34 = arith.constant 0.000000e+00 : f32
      %116 = vector.broadcast %cst_34 : f32 to vector<8x128xf32>
      %117 = arith.cmpf oge, %115, %116 : vector<8x128xf32>
      %118 = math.floor %115 : vector<8x128xf32>
      %119 = math.ceil %115 : vector<8x128xf32>
      %120 = arith.select %117, %118, %119 : vector<8x128xi1>, vector<8x128xf32>
      %cst_35 = arith.constant 6.28318548 : f32
      %121 = vector.broadcast %cst_35 : f32 to vector<8x128xf32>
      %122 = arith.mulf %121, %120 : vector<8x128xf32>
      %123 = arith.subf %113, %122 : vector<8x128xf32>
      %124 = vector.broadcast %17 : vector<1x128xf32> to vector<8x128xf32>
      %125 = arith.mulf %124, %123 : vector<8x128xf32>
      %126 = arith.mulf %123, %123 : vector<8x128xf32>
      %cst_36 = arith.constant 0.000000e+00 : f32
      %127 = vector.broadcast %cst_36 : f32 to vector<8x128xf32>
      %128 = arith.subf %127, %126 : vector<8x128xf32>
      %129 = vector.broadcast %24 : vector<1x128xf32> to vector<8x128xf32>
      %130 = arith.mulf %128, %129 : vector<8x128xf32>
      %131 = math.exp %130 : vector<8x128xf32>
      %132 = arith.mulf %125, %131 : vector<8x128xf32>
      %133 = arith.addf %111, %132 : vector<8x128xf32>
      %134 = vector.broadcast %27 : vector<1x128xf32> to vector<8x128xf32>
      %135 = arith.subf %64, %134 : vector<8x128xf32>
      %cst_37 = arith.constant 0.159154937 : f32
      %136 = vector.broadcast %cst_37 : f32 to vector<8x128xf32>
      %137 = arith.mulf %135, %136 : vector<8x128xf32>
      %cst_38 = arith.constant 0.000000e+00 : f32
      %138 = vector.broadcast %cst_38 : f32 to vector<8x128xf32>
      %139 = arith.cmpf oge, %137, %138 : vector<8x128xf32>
      %140 = math.floor %137 : vector<8x128xf32>
      %141 = math.ceil %137 : vector<8x128xf32>
      %142 = arith.select %139, %140, %141 : vector<8x128xi1>, vector<8x128xf32>
      %cst_39 = arith.constant 6.28318548 : f32
      %143 = vector.broadcast %cst_39 : f32 to vector<8x128xf32>
      %144 = arith.mulf %143, %142 : vector<8x128xf32>
      %145 = arith.subf %135, %144 : vector<8x128xf32>
      %146 = vector.broadcast %25 : vector<1x128xf32> to vector<8x128xf32>
      %147 = arith.mulf %146, %145 : vector<8x128xf32>
      %148 = arith.mulf %145, %145 : vector<8x128xf32>
      %cst_40 = arith.constant 0.000000e+00 : f32
      %149 = vector.broadcast %cst_40 : f32 to vector<8x128xf32>
      %150 = arith.subf %149, %148 : vector<8x128xf32>
      %151 = vector.broadcast %32 : vector<1x128xf32> to vector<8x128xf32>
      %152 = arith.mulf %150, %151 : vector<8x128xf32>
      %153 = math.exp %152 : vector<8x128xf32>
      %154 = arith.mulf %147, %153 : vector<8x128xf32>
      %155 = arith.addf %133, %154 : vector<8x128xf32>
      %156 = vector.broadcast %35 : vector<1x128xf32> to vector<8x128xf32>
      %157 = arith.subf %64, %156 : vector<8x128xf32>
      %cst_41 = arith.constant 0.159154937 : f32
      %158 = vector.broadcast %cst_41 : f32 to vector<8x128xf32>
      %159 = arith.mulf %157, %158 : vector<8x128xf32>
      %cst_42 = arith.constant 0.000000e+00 : f32
      %160 = vector.broadcast %cst_42 : f32 to vector<8x128xf32>
      %161 = arith.cmpf oge, %159, %160 : vector<8x128xf32>
      %162 = math.floor %159 : vector<8x128xf32>
      %163 = math.ceil %159 : vector<8x128xf32>
      %164 = arith.select %161, %162, %163 : vector<8x128xi1>, vector<8x128xf32>
      %cst_43 = arith.constant 6.28318548 : f32
      %165 = vector.broadcast %cst_43 : f32 to vector<8x128xf32>
      %166 = arith.mulf %165, %164 : vector<8x128xf32>
      %167 = arith.subf %157, %166 : vector<8x128xf32>
      %168 = vector.broadcast %33 : vector<1x128xf32> to vector<8x128xf32>
      %169 = arith.mulf %168, %167 : vector<8x128xf32>
      %170 = arith.mulf %167, %167 : vector<8x128xf32>
      %cst_44 = arith.constant 0.000000e+00 : f32
      %171 = vector.broadcast %cst_44 : f32 to vector<8x128xf32>
      %172 = arith.subf %171, %170 : vector<8x128xf32>
      %173 = vector.broadcast %40 : vector<1x128xf32> to vector<8x128xf32>
      %174 = arith.mulf %172, %173 : vector<8x128xf32>
      %175 = math.exp %174 : vector<8x128xf32>
      %176 = arith.mulf %169, %175 : vector<8x128xf32>
      %177 = arith.addf %155, %176 : vector<8x128xf32>
      %178 = arith.subf %66, %177 : vector<8x128xf32>
      %cst_45 = arith.constant 0.00462962966 : f32
      %179 = vector.broadcast %cst_45 : f32 to vector<8x128xf32>
      %180 = arith.mulf %179, %178 : vector<8x128xf32>
      %cst_46 = arith.constant 0.995370388 : f32
      %181 = vector.broadcast %cst_46 : f32 to vector<1x128xf32>
      %182 = arith.mulf %181, %arg7 : vector<1x128xf32>
      %183 = vector.extract_strided_slice %180 {offsets = [0, 0], sizes = [1, 128], strides = [1, 1]} : vector<8x128xf32> to vector<1x128xf32>
      %184 = arith.addf %182, %183 : vector<1x128xf32>
      %cst_47 = arith.constant 0.995370388 : f32
      %185 = vector.broadcast %cst_47 : f32 to vector<1x128xf32>
      %186 = arith.mulf %185, %184 : vector<1x128xf32>
      %187 = vector.extract_strided_slice %180 {offsets = [1, 0], sizes = [1, 128], strides = [1, 1]} : vector<8x128xf32> to vector<1x128xf32>
      %188 = arith.addf %186, %187 : vector<1x128xf32>
      %cst_48 = arith.constant 0.995370388 : f32
      %189 = vector.broadcast %cst_48 : f32 to vector<1x128xf32>
      %190 = arith.mulf %189, %188 : vector<1x128xf32>
      %191 = vector.extract_strided_slice %180 {offsets = [2, 0], sizes = [1, 128], strides = [1, 1]} : vector<8x128xf32> to vector<1x128xf32>
      %192 = arith.addf %190, %191 : vector<1x128xf32>
      %cst_49 = arith.constant 0.995370388 : f32
      %193 = vector.broadcast %cst_49 : f32 to vector<1x128xf32>
      %194 = arith.mulf %193, %192 : vector<1x128xf32>
      %195 = vector.extract_strided_slice %180 {offsets = [3, 0], sizes = [1, 128], strides = [1, 1]} : vector<8x128xf32> to vector<1x128xf32>
      %196 = arith.addf %194, %195 : vector<1x128xf32>
      %cst_50 = arith.constant 0.995370388 : f32
      %197 = vector.broadcast %cst_50 : f32 to vector<1x128xf32>
      %198 = arith.mulf %197, %196 : vector<1x128xf32>
      %199 = vector.extract_strided_slice %180 {offsets = [4, 0], sizes = [1, 128], strides = [1, 1]} : vector<8x128xf32> to vector<1x128xf32>
      %200 = arith.addf %198, %199 : vector<1x128xf32>
      %cst_51 = arith.constant 0.995370388 : f32
      %201 = vector.broadcast %cst_51 : f32 to vector<1x128xf32>
      %202 = arith.mulf %201, %200 : vector<1x128xf32>
      %203 = vector.extract_strided_slice %180 {offsets = [5, 0], sizes = [1, 128], strides = [1, 1]} : vector<8x128xf32> to vector<1x128xf32>
      %204 = arith.addf %202, %203 : vector<1x128xf32>
      %cst_52 = arith.constant 0.995370388 : f32
      %205 = vector.broadcast %cst_52 : f32 to vector<1x128xf32>
      %206 = arith.mulf %205, %204 : vector<1x128xf32>
      %207 = vector.extract_strided_slice %180 {offsets = [6, 0], sizes = [1, 128], strides = [1, 1]} : vector<8x128xf32> to vector<1x128xf32>
      %208 = arith.addf %206, %207 : vector<1x128xf32>
      %cst_53 = arith.constant 0.995370388 : f32
      %209 = vector.broadcast %cst_53 : f32 to vector<1x128xf32>
      %210 = arith.mulf %209, %208 : vector<1x128xf32>
      %211 = vector.extract_strided_slice %180 {offsets = [7, 0], sizes = [1, 128], strides = [1, 1]} : vector<8x128xf32> to vector<1x128xf32>
      %212 = arith.addf %210, %211 : vector<1x128xf32>
      %213 = tpu.concatenate %184, %188, %192, %196, %200, %204, %208, %212 in 0 : vector<1x128xf32>, vector<1x128xf32>, vector<1x128xf32>, vector<1x128xf32>, vector<1x128xf32>, vector<1x128xf32>, vector<1x128xf32>, vector<1x128xf32> -> vector<8x128xf32>
      %214 = arith.index_cast %62 : i32 to index
      %c0_54 = arith.constant 0 : index
      %215 = vector.load %arg5[%214, %c0_54] : memref<216x128xf32, #tpu.memory_space<vmem>>, vector<8x128xf32>
      tpu.vector_store %arg5[%214, %c0_54], %213 {strides = array<i32>} : memref<216x128xf32, #tpu.memory_space<vmem>>, vector<8x128xf32>,
      scf.yield %212 : vector<1x128xf32>
    }
    %c27_i32_12 = arith.constant 27 : i32
    %c0_13 = arith.constant 0 : index
    %c0_14 = arith.constant 0 : index
    %44 = vector.load %arg5[%c0_13, %c0_14] : memref<216x128xf32, #tpu.memory_space<vmem>>, vector<216x128xf32>
    %cst_15 = arith.constant dense<0x7F800000> : vector<128xf32>
    %45 = vector.multi_reduction <minimumf>, %44, %cst_15 [0] : vector<216x128xf32> to vector<128xf32>
    %46 = vector.shape_cast %45 : vector<128xf32> to vector<1x128xf32>
    %cst_16 = arith.constant dense<0xFF800000> : vector<128xf32>
    %47 = vector.multi_reduction <maximumf>, %44, %cst_16 [0] : vector<216x128xf32> to vector<128xf32>
    %48 = vector.shape_cast %47 : vector<128xf32> to vector<1x128xf32>
    %49 = arith.subf %48, %46 : vector<1x128xf32>
    %cst_17 = arith.constant 1.000000e-30 : f32
    %50 = vector.broadcast %cst_17 : f32 to vector<1x128xf32>
    %51 = arith.maximumf %49, %50 : vector<1x128xf32>
    %cst_18 = arith.constant 4.255700e-02 : f32
    %52 = vector.broadcast %cst_18 : f32 to vector<1x128xf32>
    %53 = arith.divf %52, %51 : vector<1x128xf32>
    %54 = vector.broadcast %46 : vector<1x128xf32> to vector<216x128xf32>
    %55 = arith.subf %44, %54 : vector<216x128xf32>
    %56 = vector.broadcast %53 : vector<1x128xf32> to vector<216x128xf32>
    %57 = arith.mulf %55, %56 : vector<216x128xf32>
    %cst_19 = arith.constant -1.563000e-02 : f32
    %58 = vector.broadcast %cst_19 : f32 to vector<216x128xf32>
    %59 = arith.addf %57, %58 : vector<216x128xf32>
    %c0_20 = arith.constant 0 : index
    %c0_21 = arith.constant 0 : index
    %60 = vector.load %arg5[%c0_20, %c0_21] : memref<216x128xf32, #tpu.memory_space<vmem>>, vector<216x128xf32>
    tpu.vector_store %arg5[%c0_20, %c0_21], %59 {strides = array<i32>} : memref<216x128xf32, #tpu.memory_space<vmem>>, vector<216x128xf32>,
    return
  }
  func.func @transform_0(%arg0: i32) -> (i32, i32) {
    %c0_i32 = arith.constant 0 : i32
    %c0_i32_0 = arith.constant 0 : i32
    %c0_i32_1 = arith.constant 0 : i32
    return %c0_i32, %c0_i32_0 : i32, i32
  }
  func.func @transform_1(%arg0: i32) -> (i32, i32) {
    %c0_i32 = arith.constant 0 : i32
    %c0_i32_0 = arith.constant 0 : i32
    %c0_i32_1 = arith.constant 0 : i32
    return %c0_i32, %c0_i32_0 : i32, i32
  }
  func.func @transform_2(%arg0: i32) -> (i32, i32) {
    %c0_i32 = arith.constant 0 : i32
    %c0_i32_0 = arith.constant 0 : i32
    return %c0_i32, %arg0 : i32, i32
  }
  func.func @transform_3(%arg0: i32) -> (i32, i32) {
    %c0_i32 = arith.constant 0 : i32
    %c0_i32_0 = arith.constant 0 : i32
    return %c0_i32, %arg0 : i32, i32
  }
  func.func @transform_4(%arg0: i32) -> (i32, i32) {
    %c0_i32 = arith.constant 0 : i32
    %c0_i32_0 = arith.constant 0 : i32
    return %c0_i32, %arg0 : i32, i32
  }
}

</mosaic_0001>

<bundles_post_ra>
// kernel: _euler_pallas.1
= control target key start
LH: loop header
LB: loop body
LE: loop exit
PB: predicated region body
PF: predicated region fallthrough
CT: control target
= control target key end

     0   :  { %9 = vsyncpa [#allocation3], 0  ;;  %s1001_s0 = inlined_call_operand.hbm [shape: f32[216,128], index: 0, kind: input, shape index: {}]   ;;  %s1002_s1 = inlined_call_operand.hbm [shape: f32[216,128], index: 1, kind: input, shape index: {}]   ;;  %s1003_s2 = inlined_call_operand.hbm [shape: f32[16,128], index: 2, kind: input, shape index: {}]   ;;  %s1004_s3 = inlined_call_operand.vmem [shape: f32[1,128], index: 3, kind: input, shape index: {}]   ;;  %s1005_s4 = inlined_call_operand.hbm [shape: f32[216,128], index: 4, kind: output, shape index: {}]  }
   0x1   :  { %10 = vsyncpa [#allocation6], 0 }
   0x2   :  { %11 = vsyncpa [#allocation4], 0  ;;  %s29_s17 = sshll.u32 %s1002_s1, 4  ;;  %s700_s18 = smov [#allocation5]   ;;  %s30_s17 = int_to_ptr.hbm [resolvable:$true] %s29_s17 }
   0x3   :  { %s31_s19 = sshll.u32 %s700_s18, 4  ;;  %s16_s22 = sshll.u32 %s1001_s0, 4  ;;  %s32_s19 = int_to_ptr.vmem [resolvable:$true] %s31_s19  ;;  %s17_s22 = int_to_ptr.hbm [resolvable:$true] %s16_s22 }
   0x4   :  { %s701_s23 = smov 128   ;;  %s702_s24 = smov 8  }
   0x5   :  { %37 = dma.hbm_to_vmem [thread:$0]  %s30_s17, 3456, %s32_s19, [#allocation6], %s701_s23, %s701_s23, %s702_s24  }
   0x6   :  { %s703_s25 = smov [#allocation2]   ;;  %s42_s1 = sshll.u32 %s1003_s2, 4  ;;  %s43_s1 = int_to_ptr.hbm [resolvable:$true] %s42_s1 }
   0x7   :  { %s18_s26 = sshll.u32 %s703_s25, 4  ;;  %s704_s0 = smov [#allocation7]   ;;  %s19_s26 = int_to_ptr.vmem [resolvable:$true] %s18_s26 }
   0x8   :  { %24 = dma.hbm_to_vmem [thread:$0]  %s17_s22, 3456, %s19_s26, [#allocation3], %s701_s23, %s701_s23, %s702_s24  }
   0x9   :  { %s44_s29 = sshll.u32 %s704_s0, 4  ;;  %s45_s29 = int_to_ptr.vmem [resolvable:$true] %s44_s29 }
   0xa   :  { %50 = dma.hbm_to_vmem [thread:$0]  %s43_s1, 256, %s45_s29, [#allocation6], %s701_s23, %s701_s23, %s702_s24  }
   0xb   :  { %686 = dma.done.wait [#allocation3], 3456  }
   0xc   :  { %687 = vsyncadd [#allocation3], 4294963840 }
   0xd   :  { %688 = dma.done.wait [#allocation6], 3712  }
   0xe   :  { %689 = vsyncadd [#allocation6], 4294963584  ;;  %v749_v0 = vld [vmem:[#allocation7] sm:$0xff]  ;;  %v751_v1 = vld [vmem:[#allocation7 + $0x8] sm:$0xff] }
   0xf   :  { %v101_v2 = vld [vmem:[%s1004_s3] sm:$0x1]   ;;  %v67_v3 = vmul.f32 2.0, %v749_v0  ;;  %v84_v4 = vmul.f32 2.0, %v751_v1  ;;  %s766_s3 = smov 0  }
  0x11   :  { %v68_v5 = vmul.f32 %v67_v3, %v749_v0  ;;  %v85_v6 = vmul.f32 %v84_v4, %v751_v1 }
  0x13   :  { %566 = vrcp.f32 %v68_v5  ;;  %vm74_vm0 = vweird.f32 %v68_v5  ;;  %v80_v10 = vand.u32 2147483648, %v68_v5  ;;  %v78_v13 = vand.u32 2147483647, %v68_v5 }
  0x14   :  { %568 = vrcp.f32 %v85_v6  ;;  %v97_v14 = vand.u32 2147483648, %v85_v6  ;;  %vm91_vm2 = vweird.f32 %v85_v6  ;;  %v95_v16 = vand.u32 2147483647, %v85_v6 }
  0x15   :  { %v81_v18 = vor.u32 1.1754944e-38, %v80_v10  ;;  %vm79_vm5 = vcmp.eq.f32.partialorder %v78_v13, 8.507059e+37 }
  0x16   :  { %v98_v21 = vor.u32 1.1754944e-38, %v97_v14  ;;  %vm96_vm7 = vcmp.eq.f32.partialorder %v95_v16, 8.507059e+37 }
  0x19   :  { %v567_v7 = vpop.eup %566 }
  0x1a   :  { %v569_v8 = vpop.eup %568  ;;  %v70_v9 = vmul.f32 %v567_v7, %v68_v5  ;;  %vm75_vm1 = vweird.f32 %v567_v7 }
  0x1b   :  { %v87_v11 = vmul.f32 %v569_v8, %v85_v6  ;;  %vm92_vm3 = vweird.f32 %v569_v8  ;;  %vm76_vm4 = vmor %vm74_vm0, %vm75_vm1 }
  0x1c   :  { %v71_v12 = vsub.f32 1.0, %v70_v9  ;;  %vm93_vm6 = vmor %vm91_vm2, %vm92_vm3 }
  0x1d   :  { %v88_v15 = vsub.f32 1.0, %v87_v11 }
  0x1e   :  { %v72_v17 = vmul.f32 %v567_v7, %v71_v12 }
  0x1f   :  { %v89_v19 = vmul.f32 %v569_v8, %v88_v15 }
  0x20   :  { %v73_v20 = vadd.f32 %v567_v7, %v72_v17 }
  0x21   :  { %v90_v22 = vadd.f32 %v569_v8, %v89_v19 }
  0x22   :  { %v77_v23 = vsel %vm76_vm4, %v567_v7, %v73_v20 }
  0x23   :  { %v760_v24 = vsel %vm79_vm5, %v81_v18, %v77_v23  ;;  %v94_v25 = vsel %vm93_vm6, %v569_v8, %v90_v22 }
  0x24   :  { %v762_v26 = vsel %vm96_vm7, %v98_v21, %v94_v25 }
  0x25 LB: > { %v114_v27 = vperm.slane %v749_v0, 2  ;;  %v133_v28 = vperm.slane %v749_v0, 5  ;;  %v152_v29 = vperm.slane %v751_v1, 0  ;;  %s778_s5 = sshll.u32 %s698_s3, 3  ;;  %v171_v30 = vperm.slane %v751_v1, 3  ;;  %s107_s3 = sadd.s32 1, %s698_s3   ;;  %s698_s3 = sphi %s766_s3, %s107_s3   ;;  %v694_v2 = vphi %v101_v2, %v255_v2  }
  0x26   : > { %v190_v31 = vperm.slane %v751_v1, 6  ;;  %s110_s6 = scalar_lea.vmem [#allocation2], %s778_s5  ;;  %v127_v4 = vperm.slane %v760_v24, 1  ;;  %v146_v8 = vperm.slane %v760_v24, 4  ;;  %v165_v12 = vperm.slane %v760_v24, 7  ;;  %s112_s7 = scalar_lea.vmem [#allocation5], %s778_s5 }
  0x27   : > { %v111_v32 = vld [vmem:[%s110_s6] sm:$0xff]  ;;  %v184_v16 = vperm.slane %v762_v26, 2  ;;  %v203_v20 = vperm.slane %v762_v26, 5  ;;  %vm277_vm13 = vcmask 1040384   ;;  %vm279_vm14 = vcmask 1041408   ;;  %s291_s8 = scalar_lea.vmem [#allocation8], %s778_s5 }
  0x28   : > { %v115_v33 = vsub.f32 %v111_v32, %v114_v27  ;;  %v134_v34 = vsub.f32 %v111_v32, %v133_v28  ;;  %v153_v35 = vsub.f32 %v111_v32, %v152_v29  ;;  %v172_v36 = vsub.f32 %v111_v32, %v171_v30  ;;  %p104_p0 = scmp.ge.s32.totalorder %s107_s3, 27  }
  0x29   : > { %v191_v37 = vsub.f32 %v111_v32, %v190_v31  ;;  %v123_v28 = vperm.slane %v749_v0, 0  ;;  %v142_v31 = vperm.slane %v749_v0, 3  ;;  %vm281_vm15 = vcmask 1042432   ;;  %s705_s9 = smov (%p104_p0), [#allocation8]   ;;  %s515_s13 = sshll.u32 (%p104_p0), %s1005_s4, 4  ;;  %s516_s13 = int_to_ptr.hbm [resolvable:$true] %s515_s13 }
  0x2a   : > { %v116_v38 = vmul.f32 0.15915494, %v115_v33  ;;  %v135_v39 = vmul.f32 0.15915494, %v134_v34  ;;  %v154_v40 = vmul.f32 0.15915494, %v153_v35 }
  0x2b   : > { %v173_v41 = vmul.f32 0.15915494, %v172_v36  ;;  %v192_v42 = vmul.f32 0.15915494, %v191_v37  ;;  %vm283_vm0 = vcmask 1043456   ;;  %vm285_vm1 = vcmask 1044480  }
  0x2c   : > { %vm117_vm8 = vcmp.ge.f32.partialorder %v116_v38, 0.0  ;;  %v118_v43 = vfloor.f32 %v116_v38  ;;  %v119_v44 = vceil.f32 %v116_v38  ;;  %vm136_vm9 = vcmp.ge.f32.partialorder %v135_v39, 0.0  ;;  %s513_s10 = sshll.u32 (%p104_p0), %s705_s9, 4  ;;  %s514_s10 = int_to_ptr.vmem [resolvable:$true] %s513_s10 }
  0x2d   : > { %v137_v45 = vfloor.f32 %v135_v39  ;;  %v138_v46 = vceil.f32 %v135_v39  ;;  %vm155_vm10 = vcmp.ge.f32.partialorder %v154_v40, 0.0  ;;  %v156_v47 = vfloor.f32 %v154_v40 }
  0x2e   : > { %v120_v48 = vsel %vm117_vm8, %v118_v43, %v119_v44  ;;  %v157_v49 = vceil.f32 %v154_v40  ;;  %vm174_vm11 = vcmp.ge.f32.partialorder %v173_v41, 0.0  ;;  %v175_v50 = vfloor.f32 %v173_v41 }
  0x2f   : > { %v121_v51 = vmul.f32 6.2831855, %v120_v48  ;;  %v139_v52 = vsel %vm136_vm9, %v137_v45, %v138_v46  ;;  %v176_v53 = vceil.f32 %v173_v41  ;;  %vm193_vm12 = vcmp.ge.f32.partialorder %v192_v42, 0.0 }
  0x30   : > { %v140_v54 = vmul.f32 6.2831855, %v139_v52  ;;  %v158_v55 = vsel %vm155_vm10, %v156_v47, %v157_v49  ;;  %v194_v56 = vfloor.f32 %v192_v42  ;;  %v195_v57 = vceil.f32 %v192_v42 }
  0x31   : > { %v122_v58 = vsub.f32 %v115_v33, %v121_v51  ;;  %v159_v59 = vmul.f32 6.2831855, %v158_v55  ;;  %v177_v60 = vsel %vm174_vm11, %v175_v50, %v176_v53  ;;  %v199_v40 = vperm.slane %v751_v1, 4 }
  0x32   : > { %v141_v61 = vsub.f32 %v134_v34, %v140_v54  ;;  %v178_v62 = vmul.f32 6.2831855, %v177_v60  ;;  %v196_v63 = vsel %vm193_vm12, %v194_v56, %v195_v57  ;;  %v161_v34 = vperm.slane %v749_v0, 6  ;;  %v113_v57 = vld [vmem:[%s112_s7] sm:$0xff] }
  0x33   : > { %v125_v3 = vmul.f32 %v122_v58, %v122_v58  ;;  %v160_v5 = vsub.f32 %v153_v35, %v159_v59  ;;  %v197_v6 = vmul.f32 6.2831855, %v196_v63  ;;  %v124_v38 = vmul.f32 %v123_v28, %v122_v58 }
  0x34   : > { %v144_v7 = vmul.f32 %v141_v61, %v141_v61  ;;  %v179_v9 = vsub.f32 %v172_v36, %v178_v62  ;;  %v180_v36 = vperm.slane %v751_v1, 1  ;;  %v143_v39 = vmul.f32 %v142_v31, %v141_v61 }
  0x35   : > { %v126_v10 = vsub.f32 0.0, %v125_v3  ;;  %v163_v11 = vmul.f32 %v160_v5, %v160_v5  ;;  %v198_v13 = vsub.f32 %v191_v37, %v197_v6  ;;  %v162_v41 = vmul.f32 %v161_v34, %v160_v5 }
  0x36   : > { %v145_v14 = vsub.f32 0.0, %v144_v7  ;;  %v182_v15 = vmul.f32 %v179_v9, %v179_v9  ;;  %v181_v43 = vmul.f32 %v180_v36, %v179_v9  ;;  %v211_v62 = vmul.f32 0.9953704, %v694_v2 }
  0x37   : > { %v128_v17 = vmul.f32 %v127_v4, %v126_v10  ;;  %v164_v18 = vsub.f32 0.0, %v163_v11  ;;  %v201_v19 = vmul.f32 %v198_v13, %v198_v13  ;;  %v200_v48 = vmul.f32 %v199_v40, %v198_v13 }
  0x38   : > { %v147_v21 = vmul.f32 %v146_v8, %v145_v14  ;;  %v183_v22 = vsub.f32 0.0, %v182_v15  ;;  %vm287_vm2 = vcmask 1045504   ;;  %vm289_vm3 = vcmask 1046528  }
  0x39   : > { %v129_v23 = vmul.f32 1.442695, %v128_v17  ;;  %v166_v25 = vmul.f32 %v165_v12, %v164_v18  ;;  %v202_v27 = vsub.f32 0.0, %v201_v19 }
  0x3a   : > { %v148_v29 = vmul.f32 1.442695, %v147_v21  ;;  %v185_v30 = vmul.f32 %v184_v16, %v183_v22 }
  0x3b   : > { %570 = vpow2.f32 %v129_v23  ;;  %v167_v32 = vmul.f32 1.442695, %v166_v25  ;;  %v204_v33 = vmul.f32 %v203_v20, %v202_v27 }
  0x3c   : > { %572 = vpow2.f32 %v148_v29  ;;  %v186_v35 = vmul.f32 1.442695, %v185_v30 }
  0x3d   : > { %574 = vpow2.f32 %v167_v32  ;;  %v205_v37 = vmul.f32 1.442695, %v204_v33 }
  0x3e   : > { %576 = vpow2.f32 %v186_v35 }
  0x3f   : > { %578 = vpow2.f32 %v205_v37 }
  0x41   : > { %v571_v42 = vpop.eup %570 }
  0x42   : > { %v573_v44 = vpop.eup %572  ;;  %v131_v45 = vmul.f32 %v571_v42, %v124_v38 }
  0x43   : > { %v575_v46 = vpop.eup %574  ;;  %v150_v47 = vmul.f32 %v573_v44, %v143_v39 }
  0x44   : > { %v577_v49 = vpop.eup %576  ;;  %v169_v50 = vmul.f32 %v575_v46, %v162_v41 }
  0x45   : > { %v579_v51 = vpop.eup %578  ;;  %v151_v52 = vadd.f32 %v150_v47, %v131_v45  ;;  %v188_v53 = vmul.f32 %v577_v49, %v181_v43 }
  0x46   : > { %v207_v55 = vmul.f32 %v579_v51, %v200_v48 }
  0x47   : > { %v170_v54 = vadd.f32 %v169_v50, %v151_v52 }
  0x49   : > { %v189_v56 = vadd.f32 %v188_v53, %v170_v54 }
  0x4b   : > { %v208_v58 = vadd.f32 %v207_v55, %v189_v56 }
  0x4d   : > { %v209_v59 = vsub.f32 %v113_v57, %v208_v58 }
  0x4f   : > { %v210_v60 = vmul.f32 0.0046296297, %v209_v59 }
  0x51   : > { %215 = vst [vmem:[#allocation1] sm:$0xff] %v210_v60  ;;  %v212_v63 = vadd.f32 %v211_v62, %v210_v60 }
  0x53   : > { %v213_v4 = vmul.f32 0.9953704, %v212_v63 }
  0x58   : > { %v217_v61 = vld [vmem:[#allocation1 + $0x1] ss:$9 sm:$0xff] }
  0x59   : > { %221 = vst [vmem:[#allocation1] sm:$0xff] %v210_v60  ;;  %v219_v5 = vadd.f32 %v217_v61, %v213_v4 }
  0x5b   : > { %v220_v7 = vmul.f32 0.9953704, %v219_v5  ;;  %v257_v19 = vperm.slane %v219_v5, 0 }
  0x5d   : > { %v278_v27 = vsel %vm277_vm13, %v212_v63, %v257_v19 }
  0x60   : > { %v223_v3 = vld [vmem:[#allocation1 + $0x2] ss:$9 sm:$0xff] }
  0x61   : > { %227 = vst [vmem:[#allocation1] sm:$0xff] %v210_v60  ;;  %v225_v8 = vadd.f32 %v223_v3, %v220_v7 }
  0x63   : > { %v226_v9 = vmul.f32 0.9953704, %v225_v8  ;;  %v260_v20 = vperm.slane %v225_v8, 0 }
  0x65   : > { %v280_v30 = vsel %vm279_vm14, %v278_v27, %v260_v20 }
  0x68   : > { %v229_v6 = vld [vmem:[#allocation1 + $0x3] ss:$9 sm:$0xff] }
  0x69   : > { %233 = vst [vmem:[#allocation1] sm:$0xff] %v210_v60  ;;  %v231_v11 = vadd.f32 %v229_v6, %v226_v9 }
  0x6b   : > { %v232_v12 = vmul.f32 0.9953704, %v231_v11  ;;  %v263_v21 = vperm.slane %v231_v11, 0 }
  0x6d   : > { %v282_v31 = vsel %vm281_vm15, %v280_v30, %v263_v21 }
  0x70   : > { %v235_v10 = vld [vmem:[#allocation1 + $0x4] ss:$9 sm:$0xff] }
  0x71   : > { %239 = vst [vmem:[#allocation1] sm:$0xff] %v210_v60  ;;  %v237_v13 = vadd.f32 %v235_v10, %v232_v12 }
  0x73   : > { %v238_v15 = vmul.f32 0.9953704, %v237_v13  ;;  %v266_v22 = vperm.slane %v237_v13, 0 }
  0x75   : > { %v284_v32 = vsel %vm283_vm0, %v282_v31, %v266_v22 }
  0x78   : > { %v241_v14 = vld [vmem:[#allocation1 + $0x5] ss:$9 sm:$0xff] }
  0x79   : > { %245 = vst [vmem:[#allocation1] sm:$0xff] %v210_v60  ;;  %v243_v16 = vadd.f32 %v241_v14, %v238_v15 }
  0x7b   : > { %v244_v17 = vmul.f32 0.9953704, %v243_v16  ;;  %v269_v25 = vperm.slane %v243_v16, 0 }
  0x7d   : > { %v286_v34 = vsel %vm285_vm1, %v284_v32, %v269_v25 }
  0x80   : > { %v247_v2 = vld [vmem:[#allocation1 + $0x6] ss:$9 sm:$0xff] }
  0x81   : > { %251 = vst [vmem:[#allocation1] sm:$0xff] %v210_v60  ;;  %v249_v18 = vadd.f32 %v247_v2, %v244_v17 }
  0x83   : > { %v250_v23 = vmul.f32 0.9953704, %v249_v18  ;;  %v272_v29 = vperm.slane %v249_v18, 0 }
  0x85   : > { %v288_v35 = vsel %vm287_vm2, %v286_v34, %v272_v29 }
  0x88   : > { %v253_v28 = vld [vmem:[#allocation1 + $0x7] ss:$9 sm:$0xff] }
  0x89   : > { %v255_v2 = vadd.f32 %v253_v28, %v250_v23  }
  0x8a   :  { %106 = sbr.rel (!%p104_p0) target bundleno = 37 (0x25), region = 65 }
  0x8b   : > { %v275_v33 = vperm.slane %v255_v2, 0 }
  0x8d   : > { %v290_v36 = vsel %vm289_vm3, %v288_v35, %v275_v33 }
  0x8e   : > { %292 = vst [vmem:[%s291_s8] sm:$0xff] %v290_v36 }
  0x95   :  { %v801_v37 = vld [vmem:[#allocation8] sm:$0xff]  ;;  %v803_v38 = vld [vmem:[#allocation8 + $0x8] sm:$0xff]  ;;  %v805_v39 = vld [vmem:[#allocation8 + $0x10] sm:$0xff] }
  0x96   :  { %v807_v40 = vld [vmem:[#allocation8 + $0x18] sm:$0xff]  ;;  %v809_v41 = vld [vmem:[#allocation8 + $0x20] sm:$0xff]  ;;  %v811_v42 = vld [vmem:[#allocation8 + $0x28] sm:$0xff] }
  0x97   :  { %v813_v43 = vld [vmem:[#allocation8 + $0x30] sm:$0xff]  ;;  %v815_v44 = vld [vmem:[#allocation8 + $0x38] sm:$0xff]  ;;  %v817_v45 = vld [vmem:[#allocation8 + $0x40] sm:$0xff]  ;;  %v320_v0 = vmin.f32 %v801_v37, %v809_v41  ;;  %v321_v1 = vmin.f32 %v803_v38, %v811_v42  ;;  %v352_v24 = vmax.f32 %v801_v37, %v809_v41  ;;  %v353_v26 = vmax.f32 %v803_v38, %v811_v42 }
  0x98   :  { %v827_v46 = vld [vmem:[#allocation8 + $0x48] sm:$0xff]  ;;  %v829_v47 = vld [vmem:[#allocation8 + $0x50] sm:$0xff]  ;;  %v831_v48 = vld [vmem:[#allocation8 + $0x58] sm:$0xff]  ;;  %v322_v49 = vmin.f32 %v805_v39, %v813_v43  ;;  %v323_v50 = vmin.f32 %v807_v40, %v815_v44  ;;  %v354_v51 = vmax.f32 %v805_v39, %v813_v43  ;;  %v355_v52 = vmax.f32 %v807_v40, %v815_v44 }
  0x99   :  { %v841_v53 = vld [vmem:[#allocation8 + $0x60] sm:$0xff]  ;;  %v843_v54 = vld [vmem:[#allocation8 + $0x68] sm:$0xff]  ;;  %v845_v55 = vld [vmem:[#allocation8 + $0x70] sm:$0xff]  ;;  %v324_v56 = vmin.f32 %v320_v0, %v817_v45  ;;  %v325_v57 = vmin.f32 %v321_v1, %v827_v46  ;;  %v356_v58 = vmax.f32 %v352_v24, %v817_v45  ;;  %v357_v59 = vmax.f32 %v353_v26, %v827_v46 }
  0x9a   :  { %v851_v60 = vld [vmem:[#allocation8 + $0x78] sm:$0xff]  ;;  %v853_v61 = vld [vmem:[#allocation8 + $0x80] sm:$0xff]  ;;  %v855_v62 = vld [vmem:[#allocation8 + $0x88] sm:$0xff]  ;;  %v326_v63 = vmin.f32 %v322_v49, %v829_v47  ;;  %v327_v3 = vmin.f32 %v323_v50, %v831_v48  ;;  %v358_v4 = vmax.f32 %v354_v51, %v829_v47  ;;  %v359_v5 = vmax.f32 %v355_v52, %v831_v48 }
  0x9b   :  { %v861_v6 = vld [vmem:[#allocation8 + $0x90] sm:$0xff]  ;;  %v863_v7 = vld [vmem:[#allocation8 + $0x98] sm:$0xff]  ;;  %v328_v8 = vmin.f32 %v324_v56, %v841_v53  ;;  %v329_v9 = vmin.f32 %v325_v57, %v843_v54  ;;  %v360_v10 = vmax.f32 %v356_v58, %v841_v53  ;;  %v361_v11 = vmax.f32 %v357_v59, %v843_v54  ;;  %v869_v12 = vld [vmem:[#allocation8 + $0xa0] sm:$0xff] }
  0x9c   :  { %v871_v13 = vld [vmem:[#allocation8 + $0xa8] sm:$0xff]  ;;  %v330_v14 = vmin.f32 %v326_v63, %v845_v55  ;;  %v331_v15 = vmin.f32 %v327_v3, %v851_v60  ;;  %v362_v16 = vmax.f32 %v358_v4, %v845_v55  ;;  %v363_v2 = vmax.f32 %v359_v5, %v851_v60  ;;  %v877_v17 = vld [vmem:[#allocation8 + $0xb0] sm:$0xff]  ;;  %v879_v18 = vld [vmem:[#allocation8 + $0xb8] sm:$0xff] }
  0x9d   :  { %v332_v19 = vmin.f32 %v328_v8, %v853_v61  ;;  %v333_v20 = vmin.f32 %v329_v9, %v855_v62  ;;  %v364_v21 = vmax.f32 %v360_v10, %v853_v61  ;;  %v365_v22 = vmax.f32 %v361_v11, %v855_v62  ;;  %v885_v23 = vld [vmem:[#allocation8 + $0xc0] sm:$0xff]  ;;  %v887_v25 = vld [vmem:[#allocation8 + $0xc8] sm:$0xff]  ;;  %v893_v31 = vld [vmem:[#allocation8 + $0xd0] sm:$0xff] }
  0x9e   :  { %v334_v27 = vmin.f32 %v330_v14, %v861_v6  ;;  %v335_v28 = vmin.f32 %v331_v15, %v863_v7  ;;  %v366_v29 = vmax.f32 %v362_v16, %v861_v6  ;;  %v367_v30 = vmax.f32 %v363_v2, %v863_v7 }
  0x9f   :  { %v336_v32 = vmin.f32 %v332_v19, %v869_v12  ;;  %v337_v33 = vmin.f32 %v333_v20, %v871_v13  ;;  %v368_v34 = vmax.f32 %v364_v21, %v869_v12  ;;  %v369_v35 = vmax.f32 %v365_v22, %v871_v13 }
  0xa0   :  { %v338_v36 = vmin.f32 %v334_v27, %v877_v17  ;;  %v339_v0 = vmin.f32 %v335_v28, %v879_v18  ;;  %v370_v1 = vmax.f32 %v366_v29, %v877_v17  ;;  %v371_v24 = vmax.f32 %v367_v30, %v879_v18 }
  0xa1   :  { %v340_v26 = vmin.f32 %v336_v32, %v885_v23  ;;  %v341_v49 = vmin.f32 %v337_v33, %v887_v25  ;;  %v372_v50 = vmax.f32 %v368_v34, %v885_v23  ;;  %v373_v51 = vmax.f32 %v369_v35, %v887_v25 }
  0xa2   :  { %v342_v52 = vmin.f32 %v338_v36, %v893_v31  ;;  %v374_v56 = vmax.f32 %v370_v1, %v893_v31 }
  0xa3   :  { %v343_v57 = vmin.f32 %v340_v26, %v341_v49  ;;  %v375_v58 = vmax.f32 %v372_v50, %v373_v51 }
  0xa4   :  { %v344_v59 = vmin.f32 %v342_v52, %v339_v0  ;;  %v376_v63 = vmax.f32 %v374_v56, %v371_v24 }
  0xa6   :  { %v345_v3 = vmin.f32 %v343_v57, %v344_v59  ;;  %v377_v4 = vmax.f32 %v375_v58, %v376_v63 }
  0xa8   :  { %v346_v5 = vrot.slane %v345_v3, 4  ;;  %v378_v8 = vrot.slane %v377_v4, 4 }
  0xaa   :  { %v347_v9 = vmin.f32 %v345_v3, %v346_v5  ;;  %v379_v10 = vmax.f32 %v377_v4, %v378_v8 }
  0xac   :  { %v348_v11 = vrot.slane %v347_v9, 2  ;;  %v380_v14 = vrot.slane %v379_v10, 2 }
  0xae   :  { %v349_v15 = vmin.f32 %v347_v9, %v348_v11  ;;  %v381_v16 = vmax.f32 %v379_v10, %v380_v14 }
  0xb0   :  { %v350_v2 = vrot.slane %v349_v15, 1  ;;  %v382_v19 = vrot.slane %v381_v16, 1 }
  0xb2   :  { %v909_v20 = vmin.f32 %v349_v15, %v350_v2  ;;  %v383_v21 = vmax.f32 %v381_v16, %v382_v19 }
  0xb4   :  { %v384_v22 = vsub.f32 %v383_v21, %v909_v20  ;;  %v401_v0 = vsub.f32 %v801_v37, %v909_v20  ;;  %v402_v24 = vsub.f32 %v803_v38, %v909_v20  ;;  %v403_v26 = vsub.f32 %v805_v39, %v909_v20 }
  0xb5   :  { %v404_v49 = vsub.f32 %v807_v40, %v909_v20  ;;  %v405_v51 = vsub.f32 %v809_v41, %v909_v20  ;;  %v406_v52 = vsub.f32 %v811_v42, %v909_v20  ;;  %v407_v37 = vsub.f32 %v813_v43, %v909_v20 }
  0xb6   :  { %v385_v27 = vmax.f32 %v384_v22, 1e-30  ;;  %v408_v38 = vsub.f32 %v815_v44, %v909_v20  ;;  %v409_v39 = vsub.f32 %v817_v45, %v909_v20  ;;  %v410_v43 = vsub.f32 %v827_v46, %v909_v20 }
  0xb7   :  { %v411_v44 = vsub.f32 %v829_v47, %v909_v20  ;;  %v412_v9 = vsub.f32 %v831_v48, %v909_v20  ;;  %v413_v46 = vsub.f32 %v841_v53, %v909_v20  ;;  %v414_v15 = vsub.f32 %v843_v54, %v909_v20 }
  0xb8   :  { %580 = vrcp.f32 %v385_v27  ;;  %v397_v30 = vand.u32 2147483648, %v385_v27  ;;  %vm391_vm4 = vweird.f32 %v385_v27  ;;  %v395_v33 = vand.u32 2147483647, %v385_v27 }
  0xb9   :  { %v415_v48 = vsub.f32 %v845_v55, %v909_v20  ;;  %v416_v53 = vsub.f32 %v851_v60, %v909_v20  ;;  %v417_v54 = vsub.f32 %v853_v61, %v909_v20  ;;  %v418_v55 = vsub.f32 %v855_v62, %v909_v20 }
  0xba   :  { %v398_v35 = vor.u32 1.1754944e-38, %v397_v30  ;;  %vm396_vm7 = vcmp.eq.f32.partialorder %v395_v33, 8.507059e+37  ;;  %v419_v60 = vsub.f32 %v861_v6, %v909_v20  ;;  %v420_v61 = vsub.f32 %v863_v7, %v909_v20 }
  0xbb   :  { %v421_v62 = vsub.f32 %v869_v12, %v909_v20  ;;  %v422_v6 = vsub.f32 %v871_v13, %v909_v20  ;;  %v423_v7 = vsub.f32 %v877_v17, %v909_v20  ;;  %v424_v12 = vsub.f32 %v879_v18, %v909_v20 }
  0xbc   :  { %v425_v13 = vsub.f32 %v885_v23, %v909_v20  ;;  %v426_v17 = vsub.f32 %v887_v25, %v909_v20  ;;  %v427_v18 = vsub.f32 %v893_v31, %v909_v20 }
  0xbe   :  { %v581_v28 = vpop.eup %580 }
  0xbf   :  { %v387_v29 = vmul.f32 %v581_v28, %v385_v27  ;;  %vm392_vm5 = vweird.f32 %v581_v28 }
  0xc0   :  { %vm393_vm6 = vmor %vm391_vm4, %vm392_vm5 }
  0xc1   :  { %v388_v32 = vsub.f32 1.0, %v387_v29 }
  0xc3   :  { %v389_v34 = vmul.f32 %v581_v28, %v388_v32 }
  0xc5   :  { %v390_v36 = vadd.f32 %v581_v28, %v389_v34 }
  0xc7   :  { %v394_v1 = vsel %vm393_vm6, %v581_v28, %v390_v36 }
  0xc8   :  { %v399_v50 = vsel %vm396_vm7, %v398_v35, %v394_v1 }
  0xc9   :  { %v924_v56 = vmul.f32 0.042557, %v399_v50 }
  0xcb   :  { %v428_v40 = vmul.f32 %v401_v0, %v924_v56  ;;  %v429_v57 = vmul.f32 %v402_v24, %v924_v56  ;;  %v430_v41 = vmul.f32 %v403_v26, %v924_v56  ;;  %v431_v58 = vmul.f32 %v404_v49, %v924_v56 }
  0xcc   :  { %v432_v42 = vmul.f32 %v405_v51, %v924_v56  ;;  %v433_v59 = vmul.f32 %v406_v52, %v924_v56  ;;  %v434_v4 = vmul.f32 %v407_v37, %v924_v56  ;;  %v435_v8 = vmul.f32 %v408_v38, %v924_v56 }
  0xcd   :  { %v455_v63 = vadd.f32 -0.01563, %v428_v40  ;;  %v456_v45 = vadd.f32 -0.01563, %v429_v57  ;;  %v457_v3 = vadd.f32 -0.01563, %v430_v41  ;;  %v436_v11 = vmul.f32 %v409_v39, %v924_v56 }
  0xce   :  { %v458_v5 = vadd.f32 -0.01563, %v431_v58  ;;  %v459_v10 = vadd.f32 -0.01563, %v432_v42  ;;  %v460_v47 = vadd.f32 -0.01563, %v433_v59  ;;  %v437_v14 = vmul.f32 %v410_v43, %v924_v56 }
  0xcf   :  { %482 = vst [vmem:[#allocation8] sm:$0xff] %v455_v63  ;;  %v461_v16 = vadd.f32 -0.01563, %v434_v4  ;;  %v438_v2 = vmul.f32 %v411_v44, %v924_v56  ;;  %v462_v19 = vadd.f32 -0.01563, %v435_v8  ;;  %v439_v21 = vmul.f32 %v412_v9, %v924_v56 }
  0xd0   :  { %483 = vst [vmem:[#allocation8 + $0x8] sm:$0xff] %v456_v45  ;;  %v463_v22 = vadd.f32 -0.01563, %v436_v11  ;;  %v440_v27 = vmul.f32 %v413_v46, %v924_v56  ;;  %v464_v28 = vadd.f32 -0.01563, %v437_v14  ;;  %v441_v29 = vmul.f32 %v414_v15, %v924_v56 }
  0xd1   :  { %484 = vst [vmem:[#allocation8 + $0x10] sm:$0xff] %v457_v3  ;;  %v465_v30 = vadd.f32 -0.01563, %v438_v2  ;;  %v442_v32 = vmul.f32 %v415_v48, %v924_v56  ;;  %v466_v33 = vadd.f32 -0.01563, %v439_v21  ;;  %v443_v34 = vmul.f32 %v416_v53, %v924_v56 }
  0xd2   :  { %485 = vst [vmem:[#allocation8 + $0x18] sm:$0xff] %v458_v5  ;;  %v467_v35 = vadd.f32 -0.01563, %v440_v27  ;;  %v444_v36 = vmul.f32 %v417_v54, %v924_v56  ;;  %v468_v0 = vadd.f32 -0.01563, %v441_v29  ;;  %v445_v1 = vmul.f32 %v418_v55, %v924_v56 }
  0xd3   :  { %486 = vst [vmem:[#allocation8 + $0x20] sm:$0xff] %v459_v10  ;;  %v469_v24 = vadd.f32 -0.01563, %v442_v32  ;;  %v446_v26 = vmul.f32 %v419_v60, %v924_v56  ;;  %v470_v49 = vadd.f32 -0.01563, %v443_v34  ;;  %v447_v50 = vmul.f32 %v420_v61, %v924_v56 }
  0xd4   :  { %487 = vst [vmem:[#allocation8 + $0x28] sm:$0xff] %v460_v47  ;;  %v471_v51 = vadd.f32 -0.01563, %v444_v36  ;;  %v448_v52 = vmul.f32 %v421_v62, %v924_v56  ;;  %v472_v37 = vadd.f32 -0.01563, %v445_v1  ;;  %v449_v38 = vmul.f32 %v422_v6, %v924_v56 }
  0xd5   :  { %488 = vst [vmem:[#allocation8 + $0x30] sm:$0xff] %v461_v16  ;;  %v473_v39 = vadd.f32 -0.01563, %v446_v26  ;;  %v450_v40 = vmul.f32 %v423_v7, %v924_v56  ;;  %v474_v57 = vadd.f32 -0.01563, %v447_v50  ;;  %v451_v41 = vmul.f32 %v424_v12, %v924_v56 }
  0xd6   :  { %489 = vst [vmem:[#allocation8 + $0x38] sm:$0xff] %v462_v19  ;;  %v475_v23 = vadd.f32 -0.01563, %v448_v52  ;;  %v452_v58 = vmul.f32 %v425_v13, %v924_v56  ;;  %v476_v42 = vadd.f32 -0.01563, %v449_v38  ;;  %v453_v59 = vmul.f32 %v426_v17, %v924_v56 }
  0xd7   :  { %490 = vst [vmem:[#allocation8 + $0x40] sm:$0xff] %v463_v22  ;;  %v477_v25 = vadd.f32 -0.01563, %v450_v40  ;;  %v454_v43 = vmul.f32 %v427_v18, %v924_v56  ;;  %v478_v44 = vadd.f32 -0.01563, %v451_v41 }
  0xd8   :  { %491 = vst [vmem:[#allocation8 + $0x48] sm:$0xff] %v464_v28  ;;  %v479_v31 = vadd.f32 -0.01563, %v452_v58  ;;  %v480_v20 = vadd.f32 -0.01563, %v453_v59 }
  0xd9   :  { %492 = vst [vmem:[#allocation8 + $0x50] sm:$0xff] %v465_v30  ;;  %v481_v63 = vadd.f32 -0.01563, %v454_v43 }
  0xda   :  { %493 = vst [vmem:[#allocation8 + $0x58] sm:$0xff] %v466_v33 }
  0xdb   :  { %494 = vst [vmem:[#allocation8 + $0x60] sm:$0xff] %v467_v35 }
  0xdc   :  { %495 = vst [vmem:[#allocation8 + $0x68] sm:$0xff] %v468_v0 }
  0xdd   :  { %496 = vst [vmem:[#allocation8 + $0x70] sm:$0xff] %v469_v24 }
  0xde   :  { %497 = vst [vmem:[#allocation8 + $0x78] sm:$0xff] %v470_v49 }
  0xdf   :  { %498 = vst [vmem:[#allocation8 + $0x80] sm:$0xff] %v471_v51 }
  0xe0   :  { %499 = vst [vmem:[#allocation8 + $0x88] sm:$0xff] %v472_v37 }
  0xe1   :  { %500 = vst [vmem:[#allocation8 + $0x90] sm:$0xff] %v473_v39 }
  0xe2   :  { %501 = vst [vmem:[#allocation8 + $0x98] sm:$0xff] %v474_v57 }
  0xe3   :  { %502 = vst [vmem:[#allocation8 + $0xa0] sm:$0xff] %v475_v23 }
  0xe4   :  { %503 = vst [vmem:[#allocation8 + $0xa8] sm:$0xff] %v476_v42 }
  0xe5   :  { %504 = vst [vmem:[#allocation8 + $0xb0] sm:$0xff] %v477_v25 }
  0xe6   :  { %505 = vst [vmem:[#allocation8 + $0xb8] sm:$0xff] %v478_v44 }
  0xe7   :  { %506 = vst [vmem:[#allocation8 + $0xc0] sm:$0xff] %v479_v31 }
  0xe8   :  { %507 = vst [vmem:[#allocation8 + $0xc8] sm:$0xff] %v480_v20 }
  0xe9   :  { %508 = vst [vmem:[#allocation8 + $0xd0] sm:$0xff] %v481_v63 }
  0xea   :  { %521 = dma.vmem_to_hbm [thread:$0]  %s514_s10, 3456, %s516_s13, [#allocation4], %s701_s23, %s701_s23, %s702_s24  }
  0xeb   :  { %690 = dma.done.wait [#allocation4], 3456  }
  0xec   :  { %691 = vsyncadd [#allocation4], 4294963840 }
  0xed   :  { %526 = vsyncpa [#allocation3], 1 }
  0xee   :  { %527 = vsyncpa [#allocation6], 1 }
  0xef   :  { %528 = vsyncpa [#allocation4], 1 }

</bundles_post_ra>
